<compile_context>
chip_gen: v6e
topology: v6e:2x2x1
jax: 0.10.0
libtpu: 0.0.40
codegen_flags: <defaults>
</compile_context>

<pallas_src>
import functools
import math

import jax
import jax.numpy as jnp
from jax.experimental import pallas as pl
from jax.experimental.pallas import tpu as pltpu

_LANES = 128
_SUBLANES = 8


def _value_net_kernel(x_ref, w1_ref, b1_ref, w2_ref, b2_ref, w3p_ref, b3_ref,
                      o_ref):
    """One batch tile of the fused 3-layer MLP value head."""
    x = x_ref[...]                                   # (TB, n_states) f32
    n_in = x.shape[1]

    # ---- Layer 1: Linear(n_states -> H) + ReLU -------------------------
    # n_states is tiny (2 for MountainCar) -> a K=2 matmul wastes a full MXU
    # fill/drain. Do it as broadcast multiply-adds on the VPU instead, keeping
    # the MXU free for the only real matmul (layer 2). Bias folded into init.
    if n_in <= 16:
        acc = b1_ref[...] + x[:, 0:1] * w1_ref[0:1, :]   # (1,H)+(TB,1)*(1,H)
        for k in range(1, n_in):
            acc = acc + x[:, k:k + 1] * w1_ref[k:k + 1, :]
        h1 = jnp.maximum(acc, 0.0)
    else:  # generic fallback for wide observation spaces
        h1 = jnp.dot(x, w1_ref[...], preferred_element_type=jnp.float32)
        h1 = jnp.maximum(h1 + b1_ref[...], 0.0)

    # ---- Layer 2: Linear(H -> H) + ReLU (the real MXU matmul) ----------
    cdt = w2_ref.dtype                               # bf16 on v6e/v7x fast path
    h2 = jnp.dot(h1.astype(cdt), w2_ref[...],
                 preferred_element_type=jnp.float32)
    h2 = jnp.maximum(h2 + b2_ref[...], 0.0)

    # ---- Layer 3: Linear(H -> 1), folded into a lane-dense (H,128) tile.
    # w3 is zero-padded to 128 output columns (real column in lane 0) so the
    # MXU tile is full width and the store is an unmasked full-lane vst.
    v = jnp.dot(h2.astype(cdt), w3p_ref[...],
                preferred_element_type=jnp.float32)
    o_ref[...] = v + b3_ref[0, 0]                    # scalar bias from SMEM


@functools.partial(jax.jit, static_argnames=("block_b", "use_bf16"))
def value_network_forward(states, params, *, block_b=512, use_bf16=False):
    """Fused 3-layer MLP value head in one Pallas kernel.

    states: (B, n_states) float32
    params: dict with w1 (n_states,H), b1 (1,H), w2 (H,H), b2 (1,H),
            w3 (H,1), b3 (1,1)  -- weights pre-transposed to (in, out).
    returns: (B, 1) float32
    """
    states = jnp.asarray(states, jnp.float32)
    B, n_states = states.shape
    H = params["w1"].shape[1]
    compute_dtype = jnp.bfloat16 if use_bf16 else jnp.float32

    # Batch tile: multiple of 8 sublanes; pad the batch so every tile is full.
    tb = max(_SUBLANES, min(block_b, B))
    tb = -(-tb // _SUBLANES) * _SUBLANES
    Bp = -(-B // tb) * tb
    if Bp != B:
        states = jnp.pad(states, ((0, Bp - B), (0, 0)))
    grid = (Bp // tb,)

    # Weight prep (layer 1 stays f32: it runs on the VPU; v5e has no bf16 VPU).
    w1 = params["w1"].astype(jnp.float32)
    b1 = params["b1"].astype(jnp.float32).reshape(1, H)
    w2 = params["w2"].astype(compute_dtype)
    b2 = params["b2"].astype(jnp.float32).reshape(1, H)
    w3 = params["w3"].astype(compute_dtype)
    b3 = params["b3"].astype(jnp.float32).reshape(1, 1)
    # Pad the (H, 1) value head to (H, 128); real output column lives in lane 0.
    w3p = jnp.zeros((H, _LANES), compute_dtype).at[:, 0:1].set(w3)

    # VMEM budget estimate (resident weights x2 buffers + pipelined I/O + acts).
    itemsize = jnp.dtype(compute_dtype).itemsize
    weight_bytes = (w1.size * 4 + b1.size * 4 + b2.size * 4
                    + w2.size * itemsize + w3p.size * itemsize)
    io_bytes = 2 * (tb * max(n_states, _LANES) * 4 + tb * _LANES * 4)
    act_bytes = 2 * tb * H * 4
    vmem_limit = int(min(max(2 * weight_bytes + io_bytes + act_bytes + (2 << 20),
                             4 << 20), 48 << 20))

    cost = pl.CostEstimate(
        flops=2 * B * (n_states * H + H * H + H),
        transcendentals=0,
        bytes_accessed=int(weight_bytes + B * n_states * 4 + B * 4),
    )

    const = lambda i: (0, 0)
    out = pl.pallas_call(
        _value_net_kernel,
        grid=grid,
        in_specs=[
            pl.BlockSpec((tb, n_states), lambda i: (i, 0)),      # states tile
            pl.BlockSpec((n_states, H), const),                  # w1 (resident)
            pl.BlockSpec((1, H), const),                         # b1
            pl.BlockSpec((H, H), const),                         # w2
            pl.BlockSpec((1, H), const),                         # b2
            pl.BlockSpec((H, _LANES), const),                    # w3 padded
            pl.BlockSpec(memory_space=pltpu.MemorySpace.SMEM),   # b3 scalar
        ],
        out_specs=pl.BlockSpec((tb, _LANES), lambda i: (i, 0)),  # lane-dense out
        out_shape=jax.ShapeDtypeStruct((Bp, _LANES), jnp.float32),
        compiler_params=pltpu.CompilerParams(
            dimension_semantics=("parallel",),
            vmem_limit_bytes=vmem_limit),
        cost_estimate=cost,
    )(states, w1, b1, w2, b2, w3p, b3)

    return out[:B, 0:1]


def init_value_network_params(key, n_states, n_hidden=256):
    """Mirror the PyTorch module init:
       hidden1/hidden2: kaiming (He) normal, zero bias
       value:           xavier uniform,      zero bias
    Weights are returned pre-transposed to (in, out)."""
    k1, k2, k3 = jax.random.split(key, 3)

    def he_normal(k, fan_in, fan_out):
        std = math.sqrt(2.0 / fan_in)
        return jax.random.normal(k, (fan_in, fan_out), jnp.float32) * std

    def xavier_uniform(k, fan_in, fan_out):
        bound = math.sqrt(6.0 / (fan_in + fan_out))
        return jax.random.uniform(k, (fan_in, fan_out), jnp.float32,
                                  minval=-bound, maxval=bound)

    return {
        "w1": he_normal(k1, n_states, n_hidden),
        "b1": jnp.zeros((1, n_hidden), jnp.float32),
        "w2": he_normal(k2, n_hidden, n_hidden),
        "b2": jnp.zeros((1, n_hidden), jnp.float32),
        "w3": xavier_uniform(k3, n_hidden, 1),
        "b3": jnp.zeros((1, 1), jnp.float32),
    }


def _reference_forward(states, p):
    h1 = jax.nn.relu(states @ p["w1"] + p["b1"])
    h2 = jax.nn.relu(h1 @ p["w2"] + p["b2"])
    return h2 @ p["w3"] + p["b3"]


if __name__ == "__main__":
    # MountainCarContinuous-v0 observation space -> n_states = 2
    batch, n_states, n_hidden = 8, 2, 256

    key = jax.random.PRNGKey(0)
    k_params, k_states = jax.random.split(key)

    params = init_value_network_params(k_params, n_states, n_hidden)
    states = jax.random.normal(k_states, (batch, n_states), jnp.float32)
    ref = _reference_forward(states, params)

    # f32 path (exact vs reference).
    out = jax.block_until_ready(value_network_forward(states, params))
    assert out.shape == (batch, 1), out.shape
    assert jnp.allclose(out, ref, atol=1e-5, rtol=1e-5), "f32 mismatch vs reference"

    # bf16 MXU path (v6e/v7x fast path) -- loose tolerance sanity check.
    out_bf16 = jax.block_until_ready(
        value_network_forward(states, params, use_bf16=True))
    assert out_bf16.shape == (batch, 1)
    assert jnp.allclose(out_bf16, ref, atol=1e-1, rtol=1e-1), "bf16 path mismatch"

    # Non-multiple-of-8 batch exercises the pad/slice path.
    states2 = jax.random.normal(jax.random.PRNGKey(1), (13, n_states), jnp.float32)
    out2 = jax.block_until_ready(value_network_forward(states2, params))
    assert out2.shape == (13, 1)
    assert jnp.allclose(out2, _reference_forward(states2, params),
                        atol=1e-5, rtol=1e-5), "padded-batch mismatch"

    print("KERNEL_OK")
</pallas_src>

<mosaic_0001>
module attributes {stable_mosaic.version = 11 : i64} {
  func.func @_value_net_kernel(%arg0: i32, %arg1: memref<8x2xf32, #tpu.memory_space<vmem>>, %arg2: memref<2x256xf32, #tpu.memory_space<vmem>>, %arg3: memref<1x256xf32, #tpu.memory_space<vmem>>, %arg4: memref<256x256xf32, #tpu.memory_space<vmem>>, %arg5: memref<1x256xf32, #tpu.memory_space<vmem>>, %arg6: memref<256x128xf32, #tpu.memory_space<vmem>>, %arg7: memref<1x1xf32, #tpu.memory_space<smem>>, %arg8: memref<8x128xf32, #tpu.memory_space<vmem>>) attributes {dimension_semantics = [#tpu.dimension_semantics<parallel>], iteration_bounds = array<i64: 1>, scalar_prefetch = 0 : i64, scratch_operands = 0 : i64, tpu.core_type = #tpu.core_type<tc>, window_params = [{transform_indices = @transform_0, window_bounds = array<i64: 8, 2>}, {pipeline_mode = #tpu.pipeline_mode<synchronous>, transform_indices = @transform_1, window_bounds = array<i64: 2, 256>}, {pipeline_mode = #tpu.pipeline_mode<synchronous>, transform_indices = @transform_2, window_bounds = array<i64: 1, 256>}, {pipeline_mode = #tpu.pipeline_mode<synchronous>, transform_indices = @transform_3, window_bounds = array<i64: 256, 256>}, {pipeline_mode = #tpu.pipeline_mode<synchronous>, transform_indices = @transform_4, window_bounds = array<i64: 1, 256>}, {pipeline_mode = #tpu.pipeline_mode<synchronous>, transform_indices = @transform_5, window_bounds = array<i64: 256, 128>}, {transform_indices = @transform_6, window_bounds = array<i64: 1, 1>}, {transform_indices = @transform_7, window_bounds = array<i64: 8, 128>}]} {
    %c0 = arith.constant 0 : index
    %c0_0 = arith.constant 0 : index
    %0 = vector.load %arg1[%c0, %c0_0] : memref<8x2xf32, #tpu.memory_space<vmem>>, vector<8x2xf32>
    %c0_1 = arith.constant 0 : index
    %c0_2 = arith.constant 0 : index
    %1 = vector.load %arg3[%c0_1, %c0_2] : memref<1x256xf32, #tpu.memory_space<vmem>>, vector<1x256xf32>
    %2 = vector.extract_strided_slice %0 {offsets = [0, 0], sizes = [8, 1], strides = [1, 1]} : vector<8x2xf32> to vector<8x1xf32>
    %c0_3 = arith.constant 0 : index
    %c0_4 = arith.constant 0 : index
    %3 = vector.load %arg2[%c0_3, %c0_4] : memref<2x256xf32, #tpu.memory_space<vmem>>, vector<1x256xf32>
    %4 = vector.broadcast %2 : vector<8x1xf32> to vector<8x256xf32>
    %5 = vector.broadcast %3 : vector<1x256xf32> to vector<8x256xf32>
    %6 = arith.mulf %4, %5 : vector<8x256xf32>
    %7 = vector.broadcast %1 : vector<1x256xf32> to vector<8x256xf32>
    %8 = arith.addf %7, %6 : vector<8x256xf32>
    %9 = vector.extract_strided_slice %0 {offsets = [0, 1], sizes = [8, 1], strides = [1, 1]} : vector<8x2xf32> to vector<8x1xf32>
    %c1 = arith.constant 1 : index
    %c0_5 = arith.constant 0 : index
    %10 = vector.load %arg2[%c1, %c0_5] : memref<2x256xf32, #tpu.memory_space<vmem>>, vector<1x256xf32>
    %11 = vector.broadcast %9 : vector<8x1xf32> to vector<8x256xf32>
    %12 = vector.broadcast %10 : vector<1x256xf32> to vector<8x256xf32>
    %13 = arith.mulf %11, %12 : vector<8x256xf32>
    %14 = arith.addf %8, %13 : vector<8x256xf32>
    %cst = arith.constant 0.000000e+00 : f32
    %15 = vector.broadcast %cst : f32 to vector<8x256xf32>
    %16 = arith.maximumf %14, %15 : vector<8x256xf32>
    %c0_6 = arith.constant 0 : index
    %c0_7 = arith.constant 0 : index
    %17 = vector.load %arg4[%c0_6, %c0_7] : memref<256x256xf32, #tpu.memory_space<vmem>>, vector<256x256xf32>
    %cst_8 = arith.constant dense<0.000000e+00> : vector<8x256xf32>
    %18 = tpu.matmul %16, %17, %cst_8 {dimension_numbers = #tpu.dot_dimension_numbers<[1], [0], [0], [1], [0, 0, 1, 1], [], []>} : vector<8x256xf32>, vector<256x256xf32>, vector<8x256xf32> -> vector<8x256xf32>
    %c0_9 = arith.constant 0 : index
    %c0_10 = arith.constant 0 : index
    %19 = vector.load %arg5[%c0_9, %c0_10] : memref<1x256xf32, #tpu.memory_space<vmem>>, vector<1x256xf32>
    %20 = vector.broadcast %19 : vector<1x256xf32> to vector<8x256xf32>
    %21 = arith.addf %18, %20 : vector<8x256xf32>
    %cst_11 = arith.constant 0.000000e+00 : f32
    %22 = vector.broadcast %cst_11 : f32 to vector<8x256xf32>
    %23 = arith.maximumf %21, %22 : vector<8x256xf32>
    %c0_12 = arith.constant 0 : index
    %c0_13 = arith.constant 0 : index
    %24 = vector.load %arg6[%c0_12, %c0_13] : memref<256x128xf32, #tpu.memory_space<vmem>>, vector<256x128xf32>
    %cst_14 = arith.constant dense<0.000000e+00> : vector<8x128xf32>
    %25 = tpu.matmul %23, %24, %cst_14 {dimension_numbers = #tpu.dot_dimension_numbers<[1], [0], [0], [1], [0, 0, 1, 1], [], []>} : vector<8x256xf32>, vector<256x128xf32>, vector<8x128xf32> -> vector<8x128xf32>
    %c0_15 = arith.constant 0 : index
    %c0_16 = arith.constant 0 : index
    %26 = memref.load %arg7[%c0_15, %c0_16] : memref<1x1xf32, #tpu.memory_space<smem>>
    %27 = vector.broadcast %26 : f32 to vector<8x128xf32>
    %28 = arith.addf %25, %27 : vector<8x128xf32>
    %c0_17 = arith.constant 0 : index
    %c0_18 = arith.constant 0 : index
    %29 = vector.load %arg8[%c0_17, %c0_18] : memref<8x128xf32, #tpu.memory_space<vmem>>, vector<8x128xf32>
    tpu.vector_store %arg8[%c0_17, %c0_18], %28 {strides = array<i32>} : memref<8x128xf32, #tpu.memory_space<vmem>>, vector<8x128xf32>,
    return
  }
  func.func @transform_0(%arg0: i32) -> (i32, i32) {
    %c0_i32 = arith.constant 0 : i32
    %c0_i32_0 = arith.constant 0 : i32
    return %arg0, %c0_i32 : i32, i32
  }
  func.func @transform_1(%arg0: i32) -> (i32, i32) {
    %c0_i32 = arith.constant 0 : i32
    %c0_i32_0 = arith.constant 0 : i32
    %c0_i32_1 = arith.constant 0 : i32
    return %c0_i32, %c0_i32_0 : i32, i32
  }
  func.func @transform_2(%arg0: i32) -> (i32, i32) {
    %c0_i32 = arith.constant 0 : i32
    %c0_i32_0 = arith.constant 0 : i32
    %c0_i32_1 = arith.constant 0 : i32
    return %c0_i32, %c0_i32_0 : i32, i32
  }
  func.func @transform_3(%arg0: i32) -> (i32, i32) {
    %c0_i32 = arith.constant 0 : i32
    %c0_i32_0 = arith.constant 0 : i32
    %c0_i32_1 = arith.constant 0 : i32
    return %c0_i32, %c0_i32_0 : i32, i32
  }
  func.func @transform_4(%arg0: i32) -> (i32, i32) {
    %c0_i32 = arith.constant 0 : i32
    %c0_i32_0 = arith.constant 0 : i32
    %c0_i32_1 = arith.constant 0 : i32
    return %c0_i32, %c0_i32_0 : i32, i32
  }
  func.func @transform_5(%arg0: i32) -> (i32, i32) {
    %c0_i32 = arith.constant 0 : i32
    %c0_i32_0 = arith.constant 0 : i32
    %c0_i32_1 = arith.constant 0 : i32
    return %c0_i32, %c0_i32_0 : i32, i32
  }
  func.func @transform_6(%arg0: i32) -> (i32, i32) {
    %c0_i32 = arith.constant 0 : i32
    %c0_i32_0 = arith.constant 0 : i32
    %c0_i32_1 = arith.constant 0 : i32
    return %c0_i32, %c0_i32_0 : i32, i32
  }
  func.func @transform_7(%arg0: i32) -> (i32, i32) {
    %c0_i32 = arith.constant 0 : i32
    %c0_i32_0 = arith.constant 0 : i32
    return %arg0, %c0_i32 : i32, i32
  }
}

</mosaic_0001>

<bundles_post_ra>
// kernel: value_network_forward.1
= control target key start
LH: loop header
LB: loop body
LE: loop exit
PB: predicated region body
PF: predicated region fallthrough
CT: control target
= control target key end

     0   :  { %v382_v0 = vmov 0   ;;  %v383_v9 = vmov 1   ;;  %s733_s0 = inlined_call_operand.vmem [shape: f32[8,2], index: 0, kind: input, shape index: {}]   ;;  %s734_s3 = inlined_call_operand.vmem [shape: f32[256,256], index: 3, kind: input, shape index: {}]   ;;  %s735_s5 = inlined_call_operand.vmem [shape: f32[256,128], index: 5, kind: input, shape index: {}]   ;;  %s736_s1 = inlined_call_operand.vmem [shape: f32[2,256], index: 1, kind: input, shape index: {}]   ;;  %s737_s2 = inlined_call_operand.vmem [shape: f32[1,256], index: 2, kind: input, shape index: {}]   ;;  %s738_s4 = inlined_call_operand.vmem [shape: f32[1,256], index: 4, kind: input, shape index: {}]   ;;  %s739_s6 = inlined_call_operand.<no memory space> [shape: f32[1,1], index: 6, kind: input, shape index: {}]   ;;  %s740_s7 = inlined_call_operand.vmem [shape: f32[8,128], index: 7, kind: output, shape index: {}]  }
   0x1   :  { %380 = vset.pattern.permute.xlu0 %v382_v0  ;;  %v27_v1 = vld [vmem:[%s733_s0] sm:$0xff]  ;;  %v115_v2 = vld [vmem:[%s734_s3 + $0xf8] sm:$0xff]  ;;  %v114_v3 = vld [vmem:[%s734_s3 + $0xf0] sm:$0xff] }
   0x2   :  { %32 = vperm.xlu0 %380, %v27_v1   ;;  %160 = vmatprep.subr.mxu0 %v115_v2  ;;  %v113_v4 = vld [vmem:[%s734_s3 + $0xe8] sm:$0xff]  ;;  %v112_v5 = vld [vmem:[%s734_s3 + $0xe0] sm:$0xff]  ;;  %v111_v6 = vld [vmem:[%s734_s3 + $0xd8] sm:$0xff] }
   0x3   :  { %161 = vmatpush1.msra.mxu0 %v114_v3  ;;  %v110_v7 = vld [vmem:[%s734_s3 + $0xd0] sm:$0xff]  ;;  %v109_v8 = vld [vmem:[%s734_s3 + $0xc8] sm:$0xff]  ;;  %v108_v10 = vld [vmem:[%s734_s3 + $0xc0] sm:$0xff] }
   0x4   :  { %162 = vmatprep.subr.mxu0 %v113_v4  ;;  %v107_v11 = vld [vmem:[%s734_s3 + $0xb8] sm:$0xff]  ;;  %v106_v12 = vld [vmem:[%s734_s3 + $0xb0] sm:$0xff]  ;;  %v105_v13 = vld [vmem:[%s734_s3 + $0xa8] sm:$0xff] }
   0x5   :  { %163 = vmatpush1.msra.mxu0 %v112_v5  ;;  %v104_v14 = vld [vmem:[%s734_s3 + $0xa0] sm:$0xff]  ;;  %v103_v15 = vld [vmem:[%s734_s3 + $0x98] sm:$0xff]  ;;  %v102_v16 = vld [vmem:[%s734_s3 + $0x90] sm:$0xff] }
   0x6   :  { %381 = vset.pattern.permute.xlu0 %v383_v9  ;;  %164 = vmatprep.subr.mxu0 %v111_v6  ;;  %v101_v17 = vld [vmem:[%s734_s3 + $0x88] sm:$0xff]  ;;  %v100_v18 = vld [vmem:[%s734_s3 + $0x80] sm:$0xff]  ;;  %v99_v19 = vld [vmem:[%s734_s3 + $0x78] sm:$0xff] }
   0x7   :  { %64 = vperm.xlu0 %381, %v27_v1   ;;  %165 = vmatpush1.msra.mxu0 %v110_v7  ;;  %v98_v20 = vld [vmem:[%s734_s3 + $0x70] sm:$0xff]  ;;  %v97_v21 = vld [vmem:[%s734_s3 + $0x68] sm:$0xff]  ;;  %v96_v22 = vld [vmem:[%s734_s3 + $0x60] sm:$0xff] }
   0x8   :  { %166 = vmatprep.subr.mxu0 %v109_v8  ;;  %v95_v23 = vld [vmem:[%s734_s3 + $0x58] sm:$0xff]  ;;  %v94_v24 = vld [vmem:[%s734_s3 + $0x50] sm:$0xff]  ;;  %v93_v25 = vld [vmem:[%s734_s3 + $0x48] sm:$0xff] }
   0x9   :  { %167 = vmatpush1.msra.mxu0 %v108_v10  ;;  %v92_v26 = vld [vmem:[%s734_s3 + $0x40] sm:$0xff]  ;;  %v91_v27 = vld [vmem:[%s734_s3 + $0x38] sm:$0xff]  ;;  %v90_v28 = vld [vmem:[%s734_s3 + $0x30] sm:$0xff] }
   0xa   :  { %168 = vmatprep.subr.mxu0 %v107_v11  ;;  %v264_v29 = vld [vmem:[%s735_s5 + $0xf8] sm:$0xff]  ;;  %v263_v31 = vld [vmem:[%s735_s5 + $0xf0] sm:$0xff]  ;;  %v89_v33 = vld [vmem:[%s734_s3 + $0x28] sm:$0xff] }
   0xb   :  { %169 = vmatpush1.msra.mxu0 %v106_v12  ;;  %343 = vmatprep.subr.mxu1 %v264_v29  ;;  %v248_v30 = vld [vmem:[%s735_s5 + $0x78] sm:$0xff]  ;;  %v247_v32 = vld [vmem:[%s735_s5 + $0x70] sm:$0xff]  ;;  %v262_v34 = vld [vmem:[%s735_s5 + $0xe8] sm:$0xff] }
   0xc   :  { %170 = vmatprep.subr.mxu0 %v105_v13  ;;  %344 = vmatpush3.msra.mxu1 %v248_v30  ;;  %v88_v35 = vld [vmem:[%s734_s3 + $0x20] sm:$0xff]  ;;  %v246_v36 = vld [vmem:[%s735_s5 + $0x68] sm:$0xff]  ;;  %v87_v37 = vld [vmem:[%s734_s3 + $0x18] sm:$0xff] }
   0xd   :  { %171 = vmatpush1.msra.mxu0 %v104_v14  ;;  %345 = vmatprep.subr.mxu1 %v263_v31  ;;  %v261_v38 = vld [vmem:[%s735_s5 + $0xe0] sm:$0xff]  ;;  %v86_v39 = vld [vmem:[%s734_s3 + $0x10] sm:$0xff]  ;;  %v85_v41 = vld [vmem:[%s734_s3 + $0x8] sm:$0xff] }
   0xe   :  { %172 = vmatprep.subr.mxu0 %v103_v15  ;;  %346 = vmatpush3.msra.mxu1 %v247_v32  ;;  %v245_v40 = vld [vmem:[%s735_s5 + $0x60] sm:$0xff]  ;;  %v260_v42 = vld [vmem:[%s735_s5 + $0xd8] sm:$0xff]  ;;  %v259_v46 = vld [vmem:[%s735_s5 + $0xd0] sm:$0xff] }
   0xf   :  { %173 = vmatpush1.msra.mxu0 %v102_v16  ;;  %347 = vmatprep.subr.mxu1 %v262_v34  ;;  %v84_v43 = vld [vmem:[%s734_s3] sm:$0xff]  ;;  %v244_v44 = vld [vmem:[%s735_s5 + $0x58] sm:$0xff]  ;;  %v146_v47 = vld [vmem:[%s734_s3 + $0x1f0] sm:$0xff] }
  0x10   :  { %174 = vmatprep.subr.mxu0 %v101_v17  ;;  %348 = vmatpush3.msra.mxu1 %v246_v36  ;;  %v147_v45 = vld [vmem:[%s734_s3 + $0x1f8] sm:$0xff]  ;;  %v243_v48 = vld [vmem:[%s735_s5 + $0x50] sm:$0xff]  ;;  %v145_v49 = vld [vmem:[%s734_s3 + $0x1e8] sm:$0xff] }
  0x11   :  { %175 = vmatpush1.msra.mxu0 %v100_v18  ;;  %349 = vmatprep.subr.mxu1 %v261_v38  ;;  %v258_v50 = vld [vmem:[%s735_s5 + $0xc8] sm:$0xff]  ;;  %v144_v51 = vld [vmem:[%s734_s3 + $0x1e0] sm:$0xff]  ;;  %v143_v53 = vld [vmem:[%s734_s3 + $0x1d8] sm:$0xff] }
  0x12   :  { %176 = vmatprep.subr.mxu0 %v99_v19  ;;  %350 = vmatpush3.msra.mxu1 %v245_v40  ;;  %v242_v52 = vld [vmem:[%s735_s5 + $0x48] sm:$0xff]  ;;  %v257_v54 = vld [vmem:[%s735_s5 + $0xc0] sm:$0xff]  ;;  %v142_v55 = vld [vmem:[%s734_s3 + $0x1d0] sm:$0xff] }
  0x13   :  { %177 = vmatpush1.msra.mxu0 %v98_v20  ;;  %351 = vmatprep.subr.mxu1 %v260_v42  ;;  %v241_v56 = vld [vmem:[%s735_s5 + $0x40] sm:$0xff]  ;;  %v141_v57 = vld [vmem:[%s734_s3 + $0x1c8] sm:$0xff]  ;;  %v256_v58 = vld [vmem:[%s735_s5 + $0xb8] sm:$0xff] }
  0x14   :  { %178 = vmatprep.subr.mxu0 %v97_v21  ;;  %352 = vmatpush3.msra.mxu1 %v244_v44  ;;  %v140_v59 = vld [vmem:[%s734_s3 + $0x1c0] sm:$0xff]  ;;  %v240_v60 = vld [vmem:[%s735_s5 + $0x38] sm:$0xff]  ;;  %v255_v62 = vld [vmem:[%s735_s5 + $0xb0] sm:$0xff] }
  0x15   :  { %179 = vmatpush1.msra.mxu0 %v96_v22  ;;  %353 = vmatprep.subr.mxu1 %v259_v46  ;;  %v139_v61 = vld [vmem:[%s734_s3 + $0x1b8] sm:$0xff]  ;;  %v138_v63 = vld [vmem:[%s734_s3 + $0x1b0] sm:$0xff]  ;;  %v137_v1 = vld [vmem:[%s734_s3 + $0x1a8] sm:$0xff] }
  0x16   :  { %180 = vmatprep.subr.mxu0 %v95_v23  ;;  %354 = vmatpush3.msra.mxu1 %v243_v48  ;;  %v239_v0 = vld [vmem:[%s735_s5 + $0x30] sm:$0xff]  ;;  %v254_v2 = vld [vmem:[%s735_s5 + $0xa8] sm:$0xff]  ;;  %v136_v3 = vld [vmem:[%s734_s3 + $0x1a0] sm:$0xff] }
  0x17   :  { %181 = vmatpush1.msra.mxu0 %v94_v24  ;;  %355 = vmatprep.subr.mxu1 %v258_v50  ;;  %v238_v4 = vld [vmem:[%s735_s5 + $0x28] sm:$0xff]  ;;  %v135_v5 = vld [vmem:[%s734_s3 + $0x198] sm:$0xff]  ;;  %v253_v6 = vld [vmem:[%s735_s5 + $0xa0] sm:$0xff] }
  0x18   :  { %182 = vmatprep.subr.mxu0 %v93_v25  ;;  %356 = vmatpush3.msra.mxu1 %v242_v52  ;;  %v134_v7 = vld [vmem:[%s734_s3 + $0x190] sm:$0xff]  ;;  %v237_v8 = vld [vmem:[%s735_s5 + $0x20] sm:$0xff]  ;;  %v133_v9 = vld [vmem:[%s734_s3 + $0x188] sm:$0xff] }
  0x19   :  { %183 = vmatpush1.msra.mxu0 %v92_v26  ;;  %357 = vmatprep.subr.mxu1 %v257_v54  ;;  %v132_v10 = vld [vmem:[%s734_s3 + $0x180] sm:$0xff]  ;;  %v131_v11 = vld [vmem:[%s734_s3 + $0x178] sm:$0xff]  ;;  %v130_v12 = vld [vmem:[%s734_s3 + $0x170] sm:$0xff] }
  0x1a   :  { %184 = vmatprep.subr.mxu0 %v91_v27  ;;  %358 = vmatpush3.msra.mxu1 %v241_v56  ;;  %v129_v13 = vld [vmem:[%s734_s3 + $0x168] sm:$0xff]  ;;  %v128_v14 = vld [vmem:[%s734_s3 + $0x160] sm:$0xff]  ;;  %v127_v15 = vld [vmem:[%s734_s3 + $0x158] sm:$0xff]  ;;  %v36_v27 = vlaneseq }
  0x1b   :  { %185 = vmatpush1.msra.mxu0 %v90_v28  ;;  %359 = vmatprep.subr.mxu1 %v256_v58  ;;  %v126_v16 = vld [vmem:[%s734_s3 + $0x150] sm:$0xff]  ;;  %v125_v17 = vld [vmem:[%s734_s3 + $0x148] sm:$0xff]  ;;  %v124_v18 = vld [vmem:[%s734_s3 + $0x140] sm:$0xff] }
  0x1c   :  { %186 = vmatprep.subr.mxu0 %v89_v33  ;;  %360 = vmatpush3.msra.mxu1 %v240_v60  ;;  %v123_v19 = vld [vmem:[%s734_s3 + $0x138] sm:$0xff]  ;;  %v122_v20 = vld [vmem:[%s734_s3 + $0x130] sm:$0xff]  ;;  %v121_v21 = vld [vmem:[%s734_s3 + $0x128] sm:$0xff]  ;;  %v37_v28 = vshrl.u32 %v36_v27, 7 }
  0x1d   :  { %187 = vmatpush1.msra.mxu0 %v88_v35  ;;  %361 = vmatprep.subr.mxu1 %v255_v62  ;;  %v120_v22 = vld [vmem:[%s734_s3 + $0x120] sm:$0xff]  ;;  %v119_v23 = vld [vmem:[%s734_s3 + $0x118] sm:$0xff]  ;;  %v118_v24 = vld [vmem:[%s734_s3 + $0x110] sm:$0xff] }
  0x1e   :  { %188 = vmatprep.subr.mxu0 %v87_v37  ;;  %362 = vmatpush3.msra.mxu1 %v239_v0  ;;  %v117_v25 = vld [vmem:[%s734_s3 + $0x108] sm:$0xff]  ;;  %v116_v26 = vld [vmem:[%s734_s3 + $0x100] sm:$0xff]  ;;  %v38_v29 = vsub.s32 0, %v37_v28  ;;  %v42_v30 = vsub.s32 1, %v37_v28  ;;  %v252_v52 = vld [vmem:[%s735_s5 + $0x98] sm:$0xff] }
  0x1f   :  { %189 = vmatpush1.msra.mxu0 %v86_v39  ;;  %363 = vmatprep.subr.mxu1 %v254_v2  ;;  %v29_v31 = vld [vmem:[%s736_s1] ss:$2 sm:$0x3]  ;;  %v342_v35 = vld [vmem:[%s736_s1 + $0x1] ss:$2 sm:$0x3] }
  0x20   :  { %190 = vmatprep.subr.mxu0 %v85_v41  ;;  %364 = vmatpush3.msra.mxu1 %v238_v4  ;;  %v28_v32 = vld [vmem:[%s737_s2] sm:$0x3]  ;;  %v39_v33 = vrot.slane %v29_v31, %v38_v29  ;;  %v43_v34 = vrot.slane %v29_v31, %v42_v30  ;;  %v71_v41 = vrot.slane %v342_v35, %v38_v29  ;;  %v251_v54 = vld [vmem:[%s735_s5 + $0x90] sm:$0xff]  ;;  %v250_v56 = vld [vmem:[%s735_s5 + $0x88] sm:$0xff] }
  0x21   :  { %191 = vmatpush1.msra.mxu0 %v84_v43  ;;  %365 = vmatprep.subr.mxu1 %v253_v6  ;;  %v52_v37 = vrot.slane %v28_v32, %v38_v29  ;;  %v56_v38 = vrot.slane %v28_v32, %v42_v30  ;;  %v75_v42 = vrot.slane %v342_v35, %v42_v30  ;;  %v249_v58 = vld [vmem:[%s735_s5 + $0x80] sm:$0xff]  ;;  %v266_v6 = vstv %s739_s6 }
  0x22   :  { %192 = vmatprep.subr.mxu0 %v147_v45  ;;  %366 = vmatpush3.msra.mxu1 %v237_v8  ;;  %v148_v60 = vld [vmem:[%s738_s4] sm:$0x3] }
  0x23   :  { %193 = vmatpush2.msra.mxu0 %v146_v47  ;;  %367 = vmatprep.subr.mxu1 %v252_v52  ;;  %v157_v62 = vrot.slane %v148_v60, %v42_v30 }
  0x24   :  { %194 = vmatprep.subr.mxu0 %v145_v49 }
  0x25   :  { %195 = vmatpush2.msra.mxu0 %v144_v51 }
  0x26   :  { %196 = vmatprep.subr.mxu0 %v143_v53  ;;  %v236_v53 = vld [vmem:[%s735_s5 + $0x18] sm:$0xff] }
  0x27   :  { %197 = vmatpush2.msra.mxu0 %v142_v55  ;;  %368 = vmatpush3.msra.mxu1 %v236_v53  ;;  %v235_v55 = vld [vmem:[%s735_s5 + $0x10] sm:$0xff] }
  0x28   :  { %198 = vmatprep.subr.mxu0 %v141_v57  ;;  %369 = vmatprep.subr.mxu1 %v251_v54  ;;  %v234_v57 = vld [vmem:[%s735_s5 + $0x8] sm:$0xff] }
  0x29   :  { %199 = vmatpush2.msra.mxu0 %v140_v59  ;;  %370 = vmatpush3.msra.mxu1 %v235_v55  ;;  %v233_v59 = vld [vmem:[%s735_s5] sm:$0xff] }
  0x2a   :  { %200 = vmatprep.subr.mxu0 %v139_v61  ;;  %371 = vmatprep.subr.mxu1 %v250_v56  ;;  %v153_v61 = vrot.slane %v148_v60, %v38_v29 }
  0x2b   :  { %201 = vmatpush2.msra.mxu0 %v138_v63  ;;  %372 = vmatpush3.msra.mxu1 %v234_v57 }
  0x2c   :  { %202 = vmatprep.subr.mxu0 %v137_v1  ;;  %373 = vmatprep.subr.mxu1 %v249_v58 }
  0x2d   :  { %203 = vmatpush2.msra.mxu0 %v136_v3  ;;  %374 = vmatpush3.msra.mxu1 %v233_v59 }
  0x2e   :  { %204 = vmatprep.subr.mxu0 %v135_v5 }
  0x2f   :  { %205 = vmatpush2.msra.mxu0 %v134_v7 }
  0x30   :  { %206 = vmatprep.subr.mxu0 %v133_v9 }
  0x31   :  { %207 = vmatpush2.msra.mxu0 %v132_v10 }
  0x32   :  { %208 = vmatprep.subr.mxu0 %v131_v11 }
  0x33   :  { %209 = vmatpush2.msra.mxu0 %v130_v12 }
  0x34   :  { %210 = vmatprep.subr.mxu0 %v129_v13 }
  0x35   :  { %211 = vmatpush2.msra.mxu0 %v128_v14 }
  0x36   :  { %212 = vmatprep.subr.mxu0 %v127_v15 }
  0x37   :  { %213 = vmatpush2.msra.mxu0 %v126_v16 }
  0x38   :  { %214 = vmatprep.subr.mxu0 %v125_v17 }
  0x39   :  { %215 = vmatpush2.msra.mxu0 %v124_v18 }
  0x3a   :  { %216 = vmatprep.subr.mxu0 %v123_v19 }
  0x3b   :  { %217 = vmatpush2.msra.mxu0 %v122_v20 }
  0x3c   :  { %218 = vmatprep.subr.mxu0 %v121_v21 }
  0x3d   :  { %219 = vmatpush2.msra.mxu0 %v120_v22 }
  0x3e   :  { %220 = vmatprep.subr.mxu0 %v119_v23 }
  0x3f   :  { %221 = vmatpush2.msra.mxu0 %v118_v24 }
  0x40   :  { %222 = vmatprep.subr.mxu0 %v117_v25 }
  0x41   :  { %223 = vmatpush2.msra.mxu0 %v116_v26 }
  0x7d   :  { %v33_v36 = vpop.permute.xlu0 %32 }
  0x7e   :  { %v46_v39 = vmul.f32 %v39_v33, %v33_v36  ;;  %v47_v40 = vmul.f32 %v43_v34, %v33_v36 }
  0x80   :  { %v59_v44 = vadd.f32 %v52_v37, %v46_v39  ;;  %v60_v47 = vadd.f32 %v56_v38, %v47_v40 }
  0x82   :  { %v65_v43 = vpop.permute.xlu0 %64 }
  0x83   :  { %v78_v45 = vmul.f32 %v71_v41, %v65_v43  ;;  %v79_v46 = vmul.f32 %v75_v42, %v65_v43 }
  0x85   :  { %v80_v48 = vadd.f32 %v78_v45, %v59_v44  ;;  %v81_v49 = vadd.f32 %v79_v46, %v60_v47 }
  0x87   :  { %v82_v50 = vmax.f32 %v80_v48, 0.0  ;;  %v83_v51 = vmax.f32 %v81_v49, 0.0 }
  0x89   :  { %224 = vmatprep.mubr.f32.mxu0 %v83_v51 }
  0x8a   :  { %225 = vmatmul.mubr.f32.vlgmr.msra.gmra.mxu0 %v82_v50 }
 0x14a   :  { %v226_v63 = vpop.f32.mrf.mxu0 }
 0x14b   :  { %v227_v0 = vadd.f32 %v226_v63, %v153_v61 }
 0x14c   :  { %v228_v1 = vpop.f32.mrf.mxu0 }
 0x14d   :  { %v229_v2 = vadd.f32 %v228_v1, %v157_v62  ;;  %v231_v4 = vmax.f32 %v227_v0, 0.0 }
 0x14f   :  { %v232_v3 = vmax.f32 %v229_v2, 0.0 }
 0x151   :  { %331 = vmatprep.mubr.f32.mxu1 %v232_v3 }
 0x152   :  { %332 = vmatmul.mubr.f32.vlgmr.msra.gmra.mxu1 %v231_v4 }
 0x212   :  { %v375_v5 = vpop.f32.mrf.mxu1 }
 0x214   :  { %v376_v7 = vpop.f32.mrf.mxu1 }
 0x215   :  { %v377_v8 = vadd.f32 %v376_v7, %v375_v5 }
 0x217   :  { %v334_v9 = vadd.f32 %v377_v8, %v266_v6 }
 0x219   :  { %337 = vst [vmem:[%s740_s7] sm:$0xff] %v334_v9 }

</bundles_post_ra>
